<compile_context>
chip_gen: v7x
topology: tpu7x:2x2x1
jax: 0.10.0
libtpu: 0.0.40
codegen_flags: <defaults>
</compile_context>

<pallas_src>
import jax
import jax.numpy as jnp
from jax.experimental import pallas as pl
from jax.experimental.pallas import tpu as pltpu


def _round_up(x: int, m: int) -> int:
    return ((x + m - 1) // m) * m


def _make_fc_kernel(num_mid: int):
    """Fused MLP kernel: Linear+ReLU, `num_mid` hidden Linear+ReLU, final Linear."""

    def kernel(x_ref, w0_ref, wmid_ref, wlast_ref, bhid_ref, blast_ref, out_ref):
        # Layer 0: [TILE_B, in] @ [in, W] + b -> ReLU
        h = jnp.dot(x_ref[...], w0_ref[...], preferred_element_type=jnp.float32)
        h = jnp.maximum(h + bhid_ref[0], 0.0)          # bhid_ref[0] is [1, W]
        # Hidden layers (unrolled): [TILE_B, W] @ [W, W] + b -> ReLU
        for i in range(num_mid):
            h = jnp.dot(h, wmid_ref[i], preferred_element_type=jnp.float32)
            h = jnp.maximum(h + bhid_ref[i + 1], 0.0)
        # Output layer: [TILE_B, W] @ [W, 1] + b (no activation)
        y = jnp.dot(h, wlast_ref[...], preferred_element_type=jnp.float32)
        out_ref[...] = (y + blast_ref[...]).astype(out_ref.dtype)

    return kernel


def fc_forward(x, weights, biases, *, tile_b: int | None = None):
    """Run the fused FC forward pass.

    Args:
      x: [batch, in_features] float32.
      weights: list of [in_i, out_i] float32 arrays (transposed vs. PyTorch's
               [out, in] convention).  Hidden layers must share the same width
               (true for the default integer-`width` config).
      biases:  list of [out_i] float32 arrays.
      tile_b:  optional batch-tile override (rounded up to a multiple of 8).

    Returns:
      [batch, 1] float32.
    """
    num_layers = len(weights)
    assert num_layers >= 2, "kernel assumes depth >= 2 (FC default depth=6)"
    batch, in_features = x.shape
    width = weights[0].shape[1]
    out_dim = weights[-1].shape[1]
    num_mid = num_layers - 2

    # TODO(synk): 'log'/'lin' width schedules (per-layer widths differ) are not
    # packed here; only the default constant-width configuration is supported.
    for w in weights[1:-1]:
        assert w.shape == (width, width), "hidden layers must share one width"

    # --- Pack parameters: 2*depth tiny operands -> 6 operands. ---
    w0 = weights[0]                                           # [in, W]
    w_last = weights[-1]                                      # [W, 1]
    if num_mid > 0:
        w_mid = jnp.stack(weights[1:-1], axis=0)              # [num_mid, W, W]
    else:
        w_mid = jnp.zeros((1, width, width), jnp.float32)     # dummy (unused)
    b_hidden = jnp.stack(
        [b.reshape(1, width) for b in biases[:-1]], axis=0)   # [depth-1, 1, W]
    b_last = biases[-1].reshape(1, out_dim)                   # [1, 1]

    # --- Batch tiling, budgeted against v7x's 64 MiB VMEM. ---
    f32 = 4
    if tile_b is None:
        x_tile_budget = 24 * (1 << 20)      # bytes for double-buffered x tiles
        cap = max(8, (x_tile_budget // (2 * in_features * f32)) // 8 * 8)
        tile_b = int(min(512, cap, _round_up(batch, 8)))
    tile_b = max(8, _round_up(int(tile_b), 8))
    padded_batch = _round_up(batch, tile_b)
    if padded_batch != batch:
        x = jnp.pad(x, ((0, padded_batch - batch), (0, 0)))
    grid = (padded_batch // tile_b,)

    in_specs = [
        pl.BlockSpec((tile_b, in_features), lambda i: (i, 0)),   # x tile (pipelined)
        pl.BlockSpec(w0.shape, lambda i: (0, 0)),                # resident weights
        pl.BlockSpec(w_mid.shape, lambda i: (0, 0, 0)),
        pl.BlockSpec(w_last.shape, lambda i: (0, 0)),
        pl.BlockSpec(b_hidden.shape, lambda i: (0, 0, 0)),
        pl.BlockSpec(b_last.shape, lambda i: (0, 0)),
    ]
    out_spec = pl.BlockSpec((tile_b, out_dim), lambda i: (i, 0))

    # --- Cost estimate (helps XLA schedule around the custom call). ---
    flops = 2 * batch * sum(int(w.shape[0]) * int(w.shape[1]) for w in weights)
    param_bytes = (sum(int(w.size) for w in weights)
                   + sum(int(b.size) for b in biases)) * f32
    bytes_accessed = (batch * in_features * f32 + param_bytes
                      + batch * out_dim * f32)
    cost = pl.CostEstimate(flops=flops, transcendentals=0,
                           bytes_accessed=bytes_accessed)

    # --- Explicit VMEM limit (double-buffered I/O tiles + resident params). ---
    x_tile_bytes = tile_b * in_features * f32
    out_tile_bytes = tile_b * out_dim * f32
    param_vmem = (w0.size + w_mid.size + w_last.size
                  + b_hidden.size + b_last.size) * f32
    act_bytes = tile_b * max(width, out_dim) * f32
    vmem_need = 2 * (x_tile_bytes + out_tile_bytes) + int(param_vmem) + 4 * act_bytes
    vmem_limit = int(min(max(2 * vmem_need, 32 * (1 << 20)), 60 * (1 << 20)))

    compiler_params = pltpu.CompilerParams(
        dimension_semantics=("parallel",),   # megacore sharding on v7x
        vmem_limit_bytes=vmem_limit,
    )

    out = pl.pallas_call(
        _make_fc_kernel(num_mid),
        out_shape=jax.ShapeDtypeStruct((padded_batch, out_dim), jnp.float32),
        grid=grid,
        in_specs=in_specs,
        out_specs=out_spec,
        compiler_params=compiler_params,
        cost_estimate=cost,
    )(x, w0, w_mid, w_last, b_hidden, b_last)

    return out[:batch]


def init_fc_params(key, in_features: int, width: int, depth: int):
    """Deterministically initialize FC parameters (integer-width config).

    layer_widths = [in_features] + (depth - 1) * [width] + [1]
    PyTorch-default-style uniform init U(-1/sqrt(fan_in), 1/sqrt(fan_in)).
    Weights returned already transposed to [in, out].
    """
    layer_widths = [in_features] + (depth - 1) * [width] + [1]
    weights, biases = [], []
    for i in range(depth):
        fan_in, fan_out = layer_widths[i], layer_widths[i + 1]
        key, kw, kb = jax.random.split(key, 3)
        bound = 1.0 / jnp.sqrt(float(fan_in))
        w = jax.random.uniform(kw, (fan_in, fan_out), jnp.float32, -bound, bound)
        b = jax.random.uniform(kb, (fan_out,), jnp.float32, -bound, bound)
        weights.append(w)
        biases.append(b)
    return weights, biases


def fc_reference(x, weights, biases):
    """Plain-JAX reference matching the PyTorch forward semantics."""
    h = x
    for i, (w, b) in enumerate(zip(weights, biases)):
        h = h @ w + b
        if i < len(weights) - 1:
            h = jnp.maximum(h, 0.0)
    return h


if __name__ == "__main__":
    # Small shapes consistent with the module's forward: x is [batch, in_features].
    batch = 8
    in_features = 64
    width = 32
    depth = 6

    key = jax.random.PRNGKey(0)
    key, kx = jax.random.split(key)
    x = jax.random.normal(kx, (batch, in_features), jnp.float32)
    weights, biases = init_fc_params(key, in_features, width, depth)

    out = jax.block_until_ready(fc_forward(x, weights, biases))
    assert out.shape == (batch, 1), out.shape
    ref = fc_reference(x, weights, biases)
    assert jnp.allclose(out, ref, atol=1e-4, rtol=1e-4), "mismatch vs reference"

    # Exercise the batch-grid + padding path (multi-tile grid, non-multiple batch).
    key, kx2 = jax.random.split(key)
    x2 = jax.random.normal(kx2, (300, in_features), jnp.float32)
    out2 = jax.block_until_ready(fc_forward(x2, weights, biases, tile_b=64))
    assert out2.shape == (300, 1), out2.shape
    ref2 = fc_reference(x2, weights, biases)
    assert jnp.allclose(out2, ref2, atol=1e-4, rtol=1e-4), "mismatch (gridded)"

    # TODO(synk): dropout / batch_norm branches of FC.__init__ are disabled by
    # default and not implemented in the kernel.
    print("KERNEL_OK")
</pallas_src>

<mosaic_0001>
module attributes {stable_mosaic.version = 11 : i64} {
  func.func @kernel(%arg0: i32, %arg1: memref<8x64xf32, #tpu.memory_space<vmem>>, %arg2: memref<64x32xf32, #tpu.memory_space<vmem>>, %arg3: memref<4x32x32xf32, #tpu.memory_space<vmem>>, %arg4: memref<32x1xf32, #tpu.memory_space<vmem>>, %arg5: memref<5x1x32xf32, #tpu.memory_space<vmem>>, %arg6: memref<1x1xf32, #tpu.memory_space<vmem>>, %arg7: memref<8x1xf32, #tpu.memory_space<vmem>>) attributes {dimension_semantics = [#tpu.dimension_semantics<parallel>], iteration_bounds = array<i64: 1>, scalar_prefetch = 0 : i64, scratch_operands = 0 : i64, tpu.core_type = #tpu.core_type<tc>, window_params = [{transform_indices = @transform_0, window_bounds = array<i64: 8, 64>}, {pipeline_mode = #tpu.pipeline_mode<synchronous>, transform_indices = @transform_1, window_bounds = array<i64: 64, 32>}, {pipeline_mode = #tpu.pipeline_mode<synchronous>, transform_indices = @transform_2, window_bounds = array<i64: 4, 32, 32>}, {pipeline_mode = #tpu.pipeline_mode<synchronous>, transform_indices = @transform_3, window_bounds = array<i64: 32, 1>}, {pipeline_mode = #tpu.pipeline_mode<synchronous>, transform_indices = @transform_4, window_bounds = array<i64: 5, 1, 32>}, {pipeline_mode = #tpu.pipeline_mode<synchronous>, transform_indices = @transform_5, window_bounds = array<i64: 1, 1>}, {transform_indices = @transform_6, window_bounds = array<i64: 8, 1>}]} {
    %c0 = arith.constant 0 : index
    %c0_0 = arith.constant 0 : index
    %0 = vector.load %arg1[%c0, %c0_0] : memref<8x64xf32, #tpu.memory_space<vmem>>, vector<8x64xf32>
    %c0_1 = arith.constant 0 : index
    %c0_2 = arith.constant 0 : index
    %1 = vector.load %arg2[%c0_1, %c0_2] : memref<64x32xf32, #tpu.memory_space<vmem>>, vector<64x32xf32>
    %cst = arith.constant dense<0.000000e+00> : vector<8x32xf32>
    %2 = tpu.matmul %0, %1, %cst {dimension_numbers = #tpu.dot_dimension_numbers<[1], [0], [0], [1], [0, 0, 1, 1], [], []>} : vector<8x64xf32>, vector<64x32xf32>, vector<8x32xf32> -> vector<8x32xf32>
    %c0_3 = arith.constant 0 : index
    %c0_4 = arith.constant 0 : index
    %c0_5 = arith.constant 0 : index
    %3 = vector.load %arg5[%c0_3, %c0_4, %c0_5] : memref<5x1x32xf32, #tpu.memory_space<vmem>>, vector<1x1x32xf32>
    %4 = vector.shape_cast %3 : vector<1x1x32xf32> to vector<1x32xf32>
    %5 = vector.broadcast %4 : vector<1x32xf32> to vector<8x32xf32>
    %6 = arith.addf %2, %5 : vector<8x32xf32>
    %cst_6 = arith.constant 0.000000e+00 : f32
    %7 = vector.broadcast %cst_6 : f32 to vector<8x32xf32>
    %8 = arith.maximumf %6, %7 : vector<8x32xf32>
    %c0_7 = arith.constant 0 : index
    %c0_8 = arith.constant 0 : index
    %c0_9 = arith.constant 0 : index
    %9 = vector.load %arg3[%c0_7, %c0_8, %c0_9] : memref<4x32x32xf32, #tpu.memory_space<vmem>>, vector<1x32x32xf32>
    %10 = vector.shape_cast %9 : vector<1x32x32xf32> to vector<32x32xf32>
    %cst_10 = arith.constant dense<0.000000e+00> : vector<8x32xf32>
    %11 = tpu.matmul %8, %10, %cst_10 {dimension_numbers = #tpu.dot_dimension_numbers<[1], [0], [0], [1], [0, 0, 1, 1], [], []>} : vector<8x32xf32>, vector<32x32xf32>, vector<8x32xf32> -> vector<8x32xf32>
    %c1 = arith.constant 1 : index
    %c0_11 = arith.constant 0 : index
    %c0_12 = arith.constant 0 : index
    %12 = vector.load %arg5[%c1, %c0_11, %c0_12] : memref<5x1x32xf32, #tpu.memory_space<vmem>>, vector<1x1x32xf32>
    %13 = vector.shape_cast %12 : vector<1x1x32xf32> to vector<1x32xf32>
    %14 = vector.broadcast %13 : vector<1x32xf32> to vector<8x32xf32>
    %15 = arith.addf %11, %14 : vector<8x32xf32>
    %cst_13 = arith.constant 0.000000e+00 : f32
    %16 = vector.broadcast %cst_13 : f32 to vector<8x32xf32>
    %17 = arith.maximumf %15, %16 : vector<8x32xf32>
    %c1_14 = arith.constant 1 : index
    %c0_15 = arith.constant 0 : index
    %c0_16 = arith.constant 0 : index
    %18 = vector.load %arg3[%c1_14, %c0_15, %c0_16] : memref<4x32x32xf32, #tpu.memory_space<vmem>>, vector<1x32x32xf32>
    %19 = vector.shape_cast %18 : vector<1x32x32xf32> to vector<32x32xf32>
    %cst_17 = arith.constant dense<0.000000e+00> : vector<8x32xf32>
    %20 = tpu.matmul %17, %19, %cst_17 {dimension_numbers = #tpu.dot_dimension_numbers<[1], [0], [0], [1], [0, 0, 1, 1], [], []>} : vector<8x32xf32>, vector<32x32xf32>, vector<8x32xf32> -> vector<8x32xf32>
    %c2 = arith.constant 2 : index
    %c0_18 = arith.constant 0 : index
    %c0_19 = arith.constant 0 : index
    %21 = vector.load %arg5[%c2, %c0_18, %c0_19] : memref<5x1x32xf32, #tpu.memory_space<vmem>>, vector<1x1x32xf32>
    %22 = vector.shape_cast %21 : vector<1x1x32xf32> to vector<1x32xf32>
    %23 = vector.broadcast %22 : vector<1x32xf32> to vector<8x32xf32>
    %24 = arith.addf %20, %23 : vector<8x32xf32>
    %cst_20 = arith.constant 0.000000e+00 : f32
    %25 = vector.broadcast %cst_20 : f32 to vector<8x32xf32>
    %26 = arith.maximumf %24, %25 : vector<8x32xf32>
    %c2_21 = arith.constant 2 : index
    %c0_22 = arith.constant 0 : index
    %c0_23 = arith.constant 0 : index
    %27 = vector.load %arg3[%c2_21, %c0_22, %c0_23] : memref<4x32x32xf32, #tpu.memory_space<vmem>>, vector<1x32x32xf32>
    %28 = vector.shape_cast %27 : vector<1x32x32xf32> to vector<32x32xf32>
    %cst_24 = arith.constant dense<0.000000e+00> : vector<8x32xf32>
    %29 = tpu.matmul %26, %28, %cst_24 {dimension_numbers = #tpu.dot_dimension_numbers<[1], [0], [0], [1], [0, 0, 1, 1], [], []>} : vector<8x32xf32>, vector<32x32xf32>, vector<8x32xf32> -> vector<8x32xf32>
    %c3 = arith.constant 3 : index
    %c0_25 = arith.constant 0 : index
    %c0_26 = arith.constant 0 : index
    %30 = vector.load %arg5[%c3, %c0_25, %c0_26] : memref<5x1x32xf32, #tpu.memory_space<vmem>>, vector<1x1x32xf32>
    %31 = vector.shape_cast %30 : vector<1x1x32xf32> to vector<1x32xf32>
    %32 = vector.broadcast %31 : vector<1x32xf32> to vector<8x32xf32>
    %33 = arith.addf %29, %32 : vector<8x32xf32>
    %cst_27 = arith.constant 0.000000e+00 : f32
    %34 = vector.broadcast %cst_27 : f32 to vector<8x32xf32>
    %35 = arith.maximumf %33, %34 : vector<8x32xf32>
    %c3_28 = arith.constant 3 : index
    %c0_29 = arith.constant 0 : index
    %c0_30 = arith.constant 0 : index
    %36 = vector.load %arg3[%c3_28, %c0_29, %c0_30] : memref<4x32x32xf32, #tpu.memory_space<vmem>>, vector<1x32x32xf32>
    %37 = vector.shape_cast %36 : vector<1x32x32xf32> to vector<32x32xf32>
    %cst_31 = arith.constant dense<0.000000e+00> : vector<8x32xf32>
    %38 = tpu.matmul %35, %37, %cst_31 {dimension_numbers = #tpu.dot_dimension_numbers<[1], [0], [0], [1], [0, 0, 1, 1], [], []>} : vector<8x32xf32>, vector<32x32xf32>, vector<8x32xf32> -> vector<8x32xf32>
    %c4 = arith.constant 4 : index
    %c0_32 = arith.constant 0 : index
    %c0_33 = arith.constant 0 : index
    %39 = vector.load %arg5[%c4, %c0_32, %c0_33] : memref<5x1x32xf32, #tpu.memory_space<vmem>>, vector<1x1x32xf32>
    %40 = vector.shape_cast %39 : vector<1x1x32xf32> to vector<1x32xf32>
    %41 = vector.broadcast %40 : vector<1x32xf32> to vector<8x32xf32>
    %42 = arith.addf %38, %41 : vector<8x32xf32>
    %cst_34 = arith.constant 0.000000e+00 : f32
    %43 = vector.broadcast %cst_34 : f32 to vector<8x32xf32>
    %44 = arith.maximumf %42, %43 : vector<8x32xf32>
    %c0_35 = arith.constant 0 : index
    %c0_36 = arith.constant 0 : index
    %45 = vector.load %arg4[%c0_35, %c0_36] : memref<32x1xf32, #tpu.memory_space<vmem>>, vector<32x1xf32>
    %cst_37 = arith.constant dense<0.000000e+00> : vector<8x1xf32>
    %46 = tpu.matmul %44, %45, %cst_37 {dimension_numbers = #tpu.dot_dimension_numbers<[1], [0], [0], [1], [0, 0, 1, 1], [], []>} : vector<8x32xf32>, vector<32x1xf32>, vector<8x1xf32> -> vector<8x1xf32>
    %c0_38 = arith.constant 0 : index
    %c0_39 = arith.constant 0 : index
    %47 = vector.load %arg6[%c0_38, %c0_39] : memref<1x1xf32, #tpu.memory_space<vmem>>, vector<1x1xf32>
    %48 = vector.broadcast %47 : vector<1x1xf32> to vector<8x1xf32>
    %49 = arith.addf %46, %48 : vector<8x1xf32>
    %c0_40 = arith.constant 0 : index
    %c0_41 = arith.constant 0 : index
    %50 = vector.load %arg7[%c0_40, %c0_41] : memref<8x1xf32, #tpu.memory_space<vmem>>, vector<8x1xf32>
    tpu.vector_store %arg7[%c0_40, %c0_41], %49 {strides = array<i32>} : memref<8x1xf32, #tpu.memory_space<vmem>>, vector<8x1xf32>,
    return
  }
  func.func @transform_0(%arg0: i32) -> (i32, i32) {
    %c0_i32 = arith.constant 0 : i32
    %c0_i32_0 = arith.constant 0 : i32
    return %arg0, %c0_i32 : i32, i32
  }
  func.func @transform_1(%arg0: i32) -> (i32, i32) {
    %c0_i32 = arith.constant 0 : i32
    %c0_i32_0 = arith.constant 0 : i32
    %c0_i32_1 = arith.constant 0 : i32
    return %c0_i32, %c0_i32_0 : i32, i32
  }
  func.func @transform_2(%arg0: i32) -> (i32, i32, i32) {
    %c0_i32 = arith.constant 0 : i32
    %c0_i32_0 = arith.constant 0 : i32
    %c0_i32_1 = arith.constant 0 : i32
    %c0_i32_2 = arith.constant 0 : i32
    return %c0_i32, %c0_i32_0, %c0_i32_1 : i32, i32, i32
  }
  func.func @transform_3(%arg0: i32) -> (i32, i32) {
    %c0_i32 = arith.constant 0 : i32
    %c0_i32_0 = arith.constant 0 : i32
    %c0_i32_1 = arith.constant 0 : i32
    return %c0_i32, %c0_i32_0 : i32, i32
  }
  func.func @transform_4(%arg0: i32) -> (i32, i32, i32) {
    %c0_i32 = arith.constant 0 : i32
    %c0_i32_0 = arith.constant 0 : i32
    %c0_i32_1 = arith.constant 0 : i32
    %c0_i32_2 = arith.constant 0 : i32
    return %c0_i32, %c0_i32_0, %c0_i32_1 : i32, i32, i32
  }
  func.func @transform_5(%arg0: i32) -> (i32, i32) {
    %c0_i32 = arith.constant 0 : i32
    %c0_i32_0 = arith.constant 0 : i32
    %c0_i32_1 = arith.constant 0 : i32
    return %c0_i32, %c0_i32_0 : i32, i32
  }
  func.func @transform_6(%arg0: i32) -> (i32, i32) {
    %c0_i32 = arith.constant 0 : i32
    %c0_i32_0 = arith.constant 0 : i32
    return %arg0, %c0_i32 : i32, i32
  }
}

</mosaic_0001>

<bundles_post_ra>
// kernel: tpu_custom_call.1
= control target key start
LH: loop header
LB: loop body
LE: loop exit
PB: predicated region body
PF: predicated region fallthrough
CT: control target
= control target key end

     0   :  { %v735_v0 = vmov 0.0|0.0   ;;  %vm736_vm0 = vmmov 0   ;;  %v737_v4 = vmov 0.0   ;;  %vm41_vm1 = vcmask 523264   ;;  %s912_s1 = inlined_call_operand.vmem [shape: f32[64,32], index: 1, kind: input, shape index: {}]   ;;  %s913_s2 = inlined_call_operand.vmem [shape: f32[4,32,32], index: 2, kind: input, shape index: {}]   ;;  %s914_s0 = inlined_call_operand.vmem [shape: f32[8,64], index: 0, kind: input, shape index: {}]   ;;  %s915_s4 = inlined_call_operand.vmem [shape: f32[5,1,32], index: 4, kind: input, shape index: {}]   ;;  %s916_s3 = inlined_call_operand.vmem [shape: f32[32,1], index: 3, kind: input, shape index: {}]   ;;  %s917_s5 = inlined_call_operand.<no memory space> [shape: f32[1,1], index: 5, kind: input, shape index: {}]   ;;  %s918_s6 = inlined_call_operand.vmem [shape: f32[8,1], index: 6, kind: output, shape index: {}]  }
   0x1   :  { %690 = vmatprep.subr.bf16.mxu0 %v735_v0  ;;  %v26_v1 = vld [vmem:[%s912_s1] sm:$0xff]  ;;  %v27_v2 = vld [vmem:[%s912_s1 + $0x8] sm:$0xff]  ;;  %v28_v3 = vld [vmem:[%s912_s1 + $0x10] sm:$0xff]  ;;  %632 = vmatprep.mubr.msk.f32.mxu0 %vm736_vm0, %v737_v4  ;;  %vm128_vm2 = vcmask 261120   ;;  %vm548_vm3 = vcmask 7168  }
   0x2   :  { %v691_v5 = vpack.c.bf16 %v27_v2, %v26_v1  ;;  %v29_v6 = vld [vmem:[%s912_s1 + $0x18] sm:$0xff]  ;;  %702 = vmatprep.subr.bf16.mxu1 %v735_v0  ;;  %643 = vmatprep.mubr.msk.f32.mxu1 %vm736_vm0, %v737_v4  ;;  %v116_v8 = vld [vmem:[%s913_s2] sm:$0xff]  ;;  %v117_v9 = vld [vmem:[%s913_s2 + $0x8] sm:$0xff] }
   0x3   :  { %v694_v7 = vpack.c.bf16 %v29_v6, %v28_v3  ;;  %v30_v10 = vld [vmem:[%s912_s1 + $0x20] sm:$0xff]  ;;  %v31_v11 = vld [vmem:[%s912_s1 + $0x28] sm:$0xff]  ;;  %v703_v12 = vpack.c.bf16 %v117_v9, %v116_v8  ;;  %v32_v14 = vld [vmem:[%s912_s1 + $0x30] sm:$0xff] }
   0x4   :  { %692 = vmatpush3.bf16.msra.mxu0 %v691_v5  ;;  %v697_v13 = vpack.c.bf16 %v31_v11, %v30_v10  ;;  %v33_v15 = vld [vmem:[%s912_s1 + $0x38] sm:$0xff]  ;;  %v25_v17 = vld [vmem:[%s914_s0] sm:$0xff]  ;;  %v118_v18 = vld [vmem:[%s913_s2 + $0x10] sm:$0xff] }
   0x5   :  { %693 = vmatprep.subr.bf16.mxu0 %v735_v0  ;;  %704 = vmatpush3.bf16.msra.mxu1 %v703_v12  ;;  %v700_v16 = vpack.c.bf16 %v33_v15, %v32_v14  ;;  %v119_v19 = vld [vmem:[%s913_s2 + $0x18] sm:$0xff]  ;;  %v554_v21 = vld [vmem:[%s915_s4] ss:$0 sm:$0xff]  ;;  %v560_v23 = vld [vmem:[%s913_s2 + $0x28] sm:$0xff] }
   0x6   :  { %705 = vmatprep.subr.bf16.mxu1 %v735_v0  ;;  %v706_v20 = vpack.c.bf16 %v119_v19, %v118_v18  ;;  %v559_v22 = vld [vmem:[%s913_s2 + $0x20] sm:$0xff]  ;;  %v561_v29 = vld [vmem:[%s913_s2 + $0x30] sm:$0xff]  ;;  %v562_v30 = vld [vmem:[%s913_s2 + $0x38] sm:$0xff] }
   0x7   :  { %v709_v27 = vpack.c.bf16 %v560_v23, %v559_v22  ;;  %v712_v31 = vpack.c.bf16 %v562_v30, %v561_v29  ;;  %v566_v32 = vld [vmem:[%s913_s2 + $0x40] sm:$0xff]  ;;  %v567_v33 = vld [vmem:[%s913_s2 + $0x48] sm:$0xff]  ;;  %v568_v40 = vld [vmem:[%s913_s2 + $0x50] sm:$0xff] }
   0x8   :  { %695 = vmatpush3.bf16.msra.mxu0 %v694_v7  ;;  %v715_v34 = vpack.c.bf16 %v567_v33, %v566_v32  ;;  %v557_v35 = vld [vmem:[%s915_s4 + $0x1] ss:$0 sm:$0xff]  ;;  %v569_v41 = vld [vmem:[%s913_s2 + $0x58] sm:$0xff]  ;;  %v574_v44 = vld [vmem:[%s913_s2 + $0x68] sm:$0xff] }
   0x9   :  { %696 = vmatprep.subr.bf16.mxu0 %v735_v0  ;;  %707 = vmatpush3.bf16.msra.mxu1 %v706_v20  ;;  %v718_v42 = vpack.c.bf16 %v569_v41, %v568_v40  ;;  %v573_v43 = vld [vmem:[%s913_s2 + $0x60] sm:$0xff]  ;;  %v575_v51 = vld [vmem:[%s913_s2 + $0x70] sm:$0xff]  ;;  %v576_v52 = vld [vmem:[%s913_s2 + $0x78] sm:$0xff] }
   0xa   :  { %708 = vmatprep.subr.bf16.mxu1 %v735_v0  ;;  %v721_v45 = vpack.c.bf16 %v574_v44, %v573_v43  ;;  %v564_v46 = vld [vmem:[%s915_s4 + $0x2] ss:$0 sm:$0xff]  ;;  %v724_v53 = vpack.c.bf16 %v576_v52, %v575_v51  ;;  %v465_v55 = vld [vmem:[%s916_s3 + $0x8] sm:$0xff]  ;;  %v571_v57 = vld [vmem:[%s915_s4 + $0x3] ss:$0 sm:$0xff] }
   0xb   :  { %v464_v54 = vld [vmem:[%s916_s3] sm:$0xff]  ;;  %v466_v62 = vld [vmem:[%s916_s3 + $0x10] sm:$0xff]  ;;  %v467_v63 = vld [vmem:[%s916_s3 + $0x18] sm:$0xff] }
   0xc   :  { %698 = vmatpush3.bf16.msra.mxu0 %v697_v13  ;;  %v727_v56 = vpack.c.bf16 %v465_v55, %v464_v54  ;;  %v730_v1 = vpack.c.bf16 %v467_v63, %v466_v62  ;;  %v578_v2 = vld [vmem:[%s915_s4 + $0x4] ss:$0 sm:$0xff] }
   0xd   :  { %699 = vmatprep.subr.bf16.mxu0 %v735_v0 }
  0x10   :  { %701 = vmatpush3.bf16.msra.mxu0 %v700_v16 }
  0x11   :  { %714 = vmatprep.subr.bf16.mxu0 %v735_v0 }
  0x13   :  { %633 = vmatmul.mubr.msk.f32.vlgmr.msra.gmra.mrb[0].mxu0 %vm41_vm1, %v25_v17 }
  0x14   :  { %665 = vmatprep.mubr.msk.f32.mxu0 %vm736_vm0, %v737_v4  ;;  %716 = vmatpush3.bf16.msra.mxu0 %v715_v34 }
  0x15   :  { %717 = vmatprep.subr.bf16.mxu0 %v735_v0 }
  0x18   :  { %719 = vmatpush3.bf16.msra.mxu0 %v718_v42 }
  0x19   :  { %726 = vmatprep.subr.bf16.mxu0 %v735_v0 }
  0xe6   :  { %v111_v24 = vpop.f32.mrb[0].mxu0 }
  0xe7   :  { %v112_v25 = vadd.f32 %v554_v21, %v111_v24  ;;  %v634_v26 = vpop.f32.mrb[1].mxu0 }
  0xe9   :  { %v115_v28 = vmax.f32 %v112_v25, 0.0 }
  0xeb   :  { %644 = vmatmul.mubr.msk.f32.vlgmr.msra.gmra.mrb[0].mxu1 %vm128_vm2, %v115_v28 }
  0xec   :  { %710 = vmatpush3.bf16.msra.mxu1 %v709_v27  ;;  %654 = vmatprep.mubr.msk.f32.mxu1 %vm736_vm0, %v737_v4 }
  0xed   :  { %711 = vmatprep.subr.bf16.mxu1 %v735_v0 }
  0xf0   :  { %713 = vmatpush3.bf16.msra.mxu1 %v712_v31 }
  0xf1   :  { %720 = vmatprep.subr.bf16.mxu1 %v735_v0 }
 0x1be   :  { %v198_v36 = vpop.f32.mrb[0].mxu1 }
 0x1bf   :  { %v199_v37 = vadd.f32 %v557_v35, %v198_v36  ;;  %v645_v38 = vpop.f32.mrb[1].mxu1 }
 0x1c1   :  { %v202_v39 = vmax.f32 %v199_v37, 0.0 }
 0x1c3   :  { %655 = vmatmul.mubr.msk.f32.vlgmr.msra.gmra.mrb[2].mxu1 %vm128_vm2, %v202_v39 }
 0x1c4   :  { %676 = vmatprep.mubr.msk.f32.mxu1 %vm736_vm0, %v737_v4  ;;  %722 = vmatpush3.bf16.msra.mxu1 %v721_v45 }
 0x1c5   :  { %723 = vmatprep.subr.bf16.mxu1 %v735_v0 }
 0x1c8   :  { %725 = vmatpush3.bf16.msra.mxu1 %v724_v53 }
 0x296   :  { %v285_v47 = vpop.f32.mrb[2].mxu1 }
 0x297   :  { %v286_v48 = vadd.f32 %v564_v46, %v285_v47  ;;  %v656_v49 = vpop.f32.mrb[3].mxu1 }
 0x299   :  { %v289_v50 = vmax.f32 %v286_v48, 0.0 }
 0x29b   :  { %666 = vmatmul.mubr.msk.f32.vlgmr.msra.gmra.mrb[2].mxu0 %vm128_vm2, %v289_v50 }
 0x29c   :  { %687 = vmatprep.mubr.msk.f32.mxu0 %vm736_vm0, %v737_v4  ;;  %728 = vmatpush3.bf16.msra.mxu0 %v727_v56 }
 0x29d   :  { %729 = vmatprep.subr.bf16.mxu0 %v735_v0  ;;  %v11_v0 = vstv %s917_s5 }
 0x29e   :  { %12 = vst [vmem:[#allocation2] sm:$0x1] %v11_v0 }
 0x2a0   :  { %731 = vmatpush3.bf16.msra.mxu0 %v730_v1 }
 0x2a5   :  { %v580_v7 = vld [vmem:[#allocation2] ss:$0 sm:$0xff] }
 0x36e   :  { %v372_v58 = vpop.f32.mrb[2].mxu0 }
 0x36f   :  { %v373_v59 = vadd.f32 %v571_v57, %v372_v58  ;;  %v667_v60 = vpop.f32.mrb[3].mxu0 }
 0x371   :  { %v376_v61 = vmax.f32 %v373_v59, 0.0 }
 0x373   :  { %677 = vmatmul.mubr.msk.f32.vlgmr.msra.gmra.mrb[4].mxu1 %vm128_vm2, %v376_v61 }
 0x446   :  { %v459_v3 = vpop.f32.mrb[4].mxu1 }
 0x447   :  { %v460_v4 = vadd.f32 %v578_v2, %v459_v3  ;;  %v678_v5 = vpop.f32.mrb[5].mxu1 }
 0x449   :  { %v463_v6 = vmax.f32 %v460_v4, 0.0 }
 0x44b   :  { %688 = vmatmul.mubr.msk.f32.vlgmr.msra.gmra.mrb[4].mxu0 %vm128_vm2, %v463_v6 }
 0x51e   :  { %v544_v8 = vpop.f32.mrb[4].mxu0 }
 0x51f   :  { %v545_v9 = vadd.f32 %v580_v7, %v544_v8  ;;  %v689_v10 = vpop.f32.mrb[5].mxu0 }
 0x521   :  { %549 = vst.msk [vmem:[%s918_s6] sm:$0xff] %vm548_vm3, %v545_v9 }

</bundles_post_ra>
